<compile_context>
chip_gen: v7x
topology: tpu7x:2x2x1
jax: 0.10.0
libtpu: 0.0.40
codegen_flags: <defaults>
</compile_context>

<pallas_src>
import jax
import jax.numpy as jnp
from jax.experimental import pallas as pl
from jax.experimental.pallas import tpu as pltpu


def _copy_kernel(x_ref, o_ref):
    # Identity copy of the current VMEM tile (lane-dense, unmasked vst for
    # full tiles; Pallas masks the ragged last block automatically).
    o_ref[...] = x_ref[...]


def _resolve_shape(total, shape):
    """Mimic torch.view's handling of a single -1 dimension."""
    shape = list(shape)
    if -1 in shape:
        idx = shape.index(-1)
        known = 1
        for i, s in enumerate(shape):
            if i != idx:
                known *= int(s)
        assert known != 0 and total % known == 0, "invalid shape for view"
        shape[idx] = total // known
    prod = 1
    for s in shape:
        prod *= int(s)
    assert prod == total, "view shape is incompatible with number of elements"
    return tuple(int(s) for s in shape)


def _round_up(n, m):
    return ((n + m - 1) // m) * m


def _pallas_identity_copy(flat_2d):
    """Identity copy of a (rows, 128) lane-dense slab through a Pallas kernel."""
    rows, lane = flat_2d.shape
    itemsize = jnp.dtype(flat_2d.dtype).itemsize
    # dtype-aware sublane packing: 8 rows for 4-byte, 16 for 2-byte, 32 for 1-byte
    sublane = max(8, 32 // itemsize)

    # Large tile: (2048, 128) f32 = 1 MiB per buffer (4 MiB total with in+out
    # double-buffered), comfortably under every generation's scoped VMEM limit
    # and near the measured HBM-roofline plateau.  For medium inputs, cap the
    # tile so the parallel grid axis has >= 2 steps (keeps both v7x TCs busy).
    max_tile_rows = 2048
    full = _round_up(rows, sublane)
    if full <= max_tile_rows:
        if rows >= 1024:  # > ~0.5 MiB f32: split so both v7x TensorCores get work
            tile_rows = _round_up(pl.cdiv(rows, 2), sublane)
        else:
            tile_rows = full
    else:
        tile_rows = max_tile_rows

    grid = (pl.cdiv(rows, tile_rows),)  # ragged last block is masked by Pallas

    return pl.pallas_call(
        _copy_kernel,
        out_shape=jax.ShapeDtypeStruct((rows, lane), flat_2d.dtype),
        grid_spec=pltpu.PrefetchScalarGridSpec(
            num_scalar_prefetch=0,
            grid=grid,
            in_specs=[pl.BlockSpec((tile_rows, lane), lambda i: (i, 0))],
            out_specs=pl.BlockSpec((tile_rows, lane), lambda i: (i, 0)),
        ),
        # Output 0 may reuse input 0's buffer: with a donated input there is no
        # second full-size HBM allocation (XLA copies defensively otherwise).
        input_output_aliases={0: 0},
        # Pure memory traffic: hint the XLA scheduler for better overlap.
        cost_estimate=pl.CostEstimate(
            flops=0,
            transcendentals=0,
            bytes_accessed=2 * rows * lane * itemsize,
        ),
        compiler_params=pltpu.CompilerParams(
            dimension_semantics=("parallel",)
        ),
    )(flat_2d)


def pallas_reshape(x, shape, *, force_pallas_copy=False, lane=128):
    """Equivalent of torch.Tensor.view(*shape).

    Default path is metadata-only (jnp.reshape), which is what .view is on a
    contiguous tensor.  Set force_pallas_copy=True to route the bytes through
    the Pallas identity-copy kernel.
    """
    total = int(x.size)
    out_shape = _resolve_shape(total, shape)

    if not force_pallas_copy:
        # Fast path: zero-copy metadata change, identical semantics to .view()
        # on a contiguous (row-major) tensor.
        return jnp.reshape(x, out_shape)

    if total % lane != 0:
        # No lane-dense 2-D slab possible; reshape is still metadata-only.
        # TODO(synk): 1-D ragged-tail Pallas copy for totals not divisible by 128.
        return jnp.reshape(x, out_shape)

    rows = total // lane
    flat = jnp.reshape(x, (rows, lane))      # metadata-only, row-major order
    out_flat = _pallas_identity_copy(flat)   # Pallas identity copy
    return jnp.reshape(out_flat, out_shape)  # metadata-only, same as .view()


if __name__ == "__main__":
    key = jax.random.PRNGKey(0)
    # Input consistent with a small conv-autoencoder feature map (NCHW).
    x = jax.random.normal(key, (2, 4, 16, 16), dtype=jnp.float32)

    # Reshape module configured to flatten per-sample features: (2, -1)
    target_shape = (2, -1)
    ref = jnp.reshape(x, (2, -1))

    # Default (metadata-only) path — mirrors torch .view exactly.
    y_fast = pallas_reshape(x, target_shape)
    # Explicit Pallas kernel path.
    y_kernel = pallas_reshape(x, target_shape, force_pallas_copy=True)
    jax.block_until_ready((y_fast, y_kernel))

    assert y_fast.shape == ref.shape and y_kernel.shape == ref.shape
    assert jnp.array_equal(y_fast, ref)
    assert jnp.array_equal(y_kernel, ref)

    # Ragged case: rows = 15 (not a multiple of the sublane), handled by the
    # cdiv grid + masked partial block — no pad/concatenate, no post-slice.
    x2 = jax.random.normal(jax.random.PRNGKey(0), (5, 3, 128), dtype=jnp.float32)
    y2 = pallas_reshape(x2, (-1, 64), force_pallas_copy=True)
    jax.block_until_ready(y2)
    assert jnp.array_equal(y2, jnp.reshape(x2, (-1, 64)))

    print("KERNEL_OK")
</pallas_src>

<mosaic_0001>
module attributes {stable_mosaic.version = 11 : i64} {
  func.func @_copy_kernel(%arg0: i32, %arg1: memref<16x128xf32, #tpu.memory_space<vmem>>, %arg2: memref<16x128xf32, #tpu.memory_space<vmem>>) attributes {dimension_semantics = [#tpu.dimension_semantics<parallel>], iteration_bounds = array<i64: 1>, scalar_prefetch = 0 : i64, scratch_operands = 0 : i64, tpu.core_type = #tpu.core_type<tc>, window_params = [{transform_indices = @transform_0, window_bounds = array<i64: 16, 128>}, {transform_indices = @transform_1, window_bounds = array<i64: 16, 128>}]} {
    %c0 = arith.constant 0 : index
    %c0_0 = arith.constant 0 : index
    %0 = vector.load %arg1[%c0, %c0_0] : memref<16x128xf32, #tpu.memory_space<vmem>>, vector<16x128xf32>
    %c0_1 = arith.constant 0 : index
    %c0_2 = arith.constant 0 : index
    %1 = vector.load %arg2[%c0_1, %c0_2] : memref<16x128xf32, #tpu.memory_space<vmem>>, vector<16x128xf32>
    tpu.vector_store %arg2[%c0_1, %c0_2], %0 {strides = array<i32>} : memref<16x128xf32, #tpu.memory_space<vmem>>, vector<16x128xf32>,
    return
  }
  func.func @transform_0(%arg0: i32) -> (i32, i32) {
    %c0_i32 = arith.constant 0 : i32
    %c0_i32_0 = arith.constant 0 : i32
    return %arg0, %c0_i32 : i32, i32
  }
  func.func @transform_1(%arg0: i32) -> (i32, i32) {
    %c0_i32 = arith.constant 0 : i32
    %c0_i32_0 = arith.constant 0 : i32
    return %arg0, %c0_i32 : i32, i32
  }
}

</mosaic_0001>

<bundles_post_ra>
// kernel: tpu_custom_call.1
= control target key start
LH: loop header
LB: loop body
LE: loop exit
PB: predicated region body
PF: predicated region fallthrough
CT: control target
= control target key end

     0   :  { %6 = vsyncpa [#allocation3], 0  ;;  %s134_s0 = inlined_call_operand.hbm [shape: f32[16,128], index: 0, kind: input, shape index: {}, may-alias: {0,1}]   ;;  %s135_s1 = inlined_call_operand.hbm [shape: f32[16,128], index: 1, kind: output, shape index: {}, may-alias: {0,1}]  }
   0x1   :  { %7 = vsyncpa [#allocation4], 0  ;;  %s96_s6 = smov [#allocation2]   ;;  %s48_s10 = scalar_lea.hbm %s134_s0, 256 }
   0x2   :  { %s13_s7 = sshll.u32 %s96_s6, 4  ;;  %p49_p0 = scmp.ne.s32.totalorder %s134_s0, %s48_s10  ;;  %s14_s7 = int_to_ptr.vmem [resolvable:$true] %s13_s7 }
   0x3   :  { %p52_p1 = scmp.lt.u32.totalorder %s48_s10, %s134_s0 }
   0x5   :  { %p54_p2 = pnand %p52_p1, %p49_p0 }
   0x7   :  { %57 = shalt.err (!%p54_p2)
}
   0x8   :  { %s58_s15 = scalar_lea.vmem %s14_s7, 256  ;;  %p63_p4 = scmp.lt.s32.totalorder %s14_s7, %s14_s7 }
   0x9   :  { %p59_p3 = scmp.ne.s32.totalorder %s14_s7, %s58_s15  ;;  %p64_p5 = scmp.lt.s32.totalorder %s58_s15, %s58_s15 }
   0xb   :  { %p65_p6 = por %p64_p5, %p63_p4 }
   0xd   :  { %p66_p7 = pnand %p65_p6, %p59_p3 }
   0xf   :  { %69 = shalt.err (!%p66_p7)
}
  0x10   :  { %s97_s16 = smov 128   ;;  %s98_s17 = smov 8  }
  0x11   :  { %19 = dma.hbm_to_vmem [thread:$0]  %s134_s0, 256, %s14_s7, [#allocation3], %s97_s16, %s97_s16, %s98_s17  }
  0x12   :  { %92 = dma.done.wait [#allocation3], 256  }
  0x13   :  { %93 = vsyncadd [#allocation3], 4294967040  ;;  %s99_s20 = smov [#allocation5]   ;;  %v23_v0 = vld [vmem:[#allocation2] sm:$0xff]  ;;  %v24_v1 = vld [vmem:[#allocation2 + $0x8] sm:$0xff] }
  0x14   :  { %s32_s21 = sshll.u32 %s99_s20, 4  ;;  %25 = vst [vmem:[#allocation5] sm:$0xff] %v23_v0  ;;  %26 = vst [vmem:[#allocation5 + $0x8] sm:$0xff] %v24_v1  ;;  %s33_s21 = int_to_ptr.vmem [resolvable:$true] %s32_s21 }
  0x15   :  { %s70_s22 = scalar_lea.vmem %s33_s21, 256  ;;  %p75_p9 = scmp.lt.s32.totalorder %s33_s21, %s33_s21 }
  0x16   :  { %p71_p8 = scmp.ne.s32.totalorder %s33_s21, %s70_s22  ;;  %p76_p10 = scmp.lt.s32.totalorder %s70_s22, %s70_s22 }
  0x18   :  { %p77_p11 = por %p76_p10, %p75_p9 }
  0x1a   :  { %p78_p12 = pnand %p77_p11, %p71_p8 }
  0x1c   :  { %81 = shalt.err (!%p78_p12)
}
  0x1d   :  { %s82_s0 = scalar_lea.hbm %s135_s1, 256 }
  0x1e   :  { %p83_p13 = scmp.ne.s32.totalorder %s135_s1, %s82_s0  ;;  %p86_p0 = scmp.lt.u32.totalorder %s82_s0, %s135_s1 }
  0x20   :  { %p88_p1 = pnand %p86_p0, %p83_p13 }
  0x22   :  { %91 = shalt.err (!%p88_p1)
}
  0x23   :  { %38 = dma.vmem_to_hbm [thread:$0]  %s33_s21, 256, %s135_s1, [#allocation4], %s97_s16, %s97_s16, %s98_s17  }
  0x24   :  { %94 = dma.done.wait [#allocation4], 256  }
  0x25   :  { %95 = vsyncadd [#allocation4], 4294967040 }
  0x26   :  { %42 = vsyncpa [#allocation3], 1 }
  0x27   :  { %43 = vsyncpa [#allocation4], 1 }

</bundles_post_ra>
